<compile_context>
chip_gen: v5e
topology: v5e:2x2
jax: 0.10.0
libtpu: 0.0.40
codegen_flags: <defaults>
</compile_context>

<pallas_src>
import functools

import jax
import jax.numpy as jnp
from jax.experimental import pallas as pl
from jax.experimental.pallas import tpu as pltpu


# ---------------------------------------------------------------------------
# Pallas kernel: fused  relu(x@W1^T+b1) -> @W2^T+b2 -> adj matmul (+hoisted c)
# One invocation processes all B batch elements.
# ---------------------------------------------------------------------------
def _mlp_encoder_kernel(x_ref, w1t_ref, b1_ref, w2t_ref, b2_ref, adj_ref,
                        c_ref, out_ref, *, B, d, n_out):
    # x_ref   : (B*d, n_xdims)   all batch elements, batch folded into rows
    # w1t_ref : (n_xdims, n_hid) fc1.weight, pre-transposed in wrapper
    # b1_ref  : (1, n_hid)       fc1.bias
    # w2t_ref : (n_hid, n_out)   fc2.weight, pre-transposed in wrapper
    # b2_ref  : (1, n_out)       fc2.bias
    # adj_ref : (d, d)           adj_Aforz = I - sinh(3*adj_A)^T
    # c_ref   : (d, n_out)       hoisted constant: rowsum(adj)[:,None]*Wa - Wa
    # out_ref : (B*d, 2*n_out)   [x | logits] concatenated on the lane axis
    x = x_ref[...]

    # H1 = relu(fc1(inputs)); xz = fc2(H1)  -- both as one (B*d, .) matmul
    h1 = jnp.dot(x, w1t_ref[...], preferred_element_type=jnp.float32) + b1_ref[...]
    h1 = jnp.maximum(h1, 0.0)
    xz = jnp.dot(h1, w2t_ref[...], preferred_element_type=jnp.float32) + b2_ref[...]

    # logits = adj_Aforz @ (x + Wa) - Wa  ==  adj_Aforz @ x + c   (c hoisted)
    adj = adj_ref[...]
    c = c_ref[...]
    blocks = []
    for b in range(B):                               # static unroll, B small
        xz_b = xz[b * d:(b + 1) * d, :]              # static slice of value
        blocks.append(jnp.dot(adj, xz_b, preferred_element_type=jnp.float32) + c)
    logits = jnp.concatenate(blocks, axis=0)         # (B*d, n_out)

    # Single lane-concatenated store instead of two narrow output streams.
    out_ref[...] = jnp.concatenate([xz, logits], axis=-1)


def mlp_encoder_pallas(inputs, adj_Aforz, W1, b1, W2, b2, Wa):
    B, d, n_xdims = inputs.shape
    n_hid = W1.shape[0]
    n_out = W2.shape[0]

    # One-time layout plumbing outside the kernel (grid-invariant):
    x2d = inputs.reshape(B * d, n_xdims)
    W1T = W1.T                                   # (n_xdims, n_hid)
    W2T = W2.T                                   # (n_hid, n_out)
    b1_2d = b1.reshape(1, n_hid)
    b2_2d = b2.reshape(1, n_out)
    # Hoisted Wa algebra: adj @ (x + Wa) - Wa == adj @ x + c
    c = (jnp.sum(adj_Aforz, axis=1, keepdims=True) * Wa[None, :]
         - Wa[None, :])                          # (d, n_out)

    kernel = functools.partial(_mlp_encoder_kernel, B=B, d=d, n_out=n_out)

    grid_spec = pltpu.PrefetchScalarGridSpec(
        num_scalar_prefetch=0,
        grid=(1,),                               # single step: no per-batch grid
        in_specs=[
            pl.BlockSpec((B * d, n_xdims), lambda i: (0, 0)),  # x slab
            pl.BlockSpec((n_xdims, n_hid), lambda i: (0, 0)),  # W1^T
            pl.BlockSpec((1, n_hid), lambda i: (0, 0)),        # b1
            pl.BlockSpec((n_hid, n_out), lambda i: (0, 0)),    # W2^T
            pl.BlockSpec((1, n_out), lambda i: (0, 0)),        # b2
            pl.BlockSpec((d, d), lambda i: (0, 0)),            # adj_Aforz
            pl.BlockSpec((d, n_out), lambda i: (0, 0)),        # c
        ],
        out_specs=pl.BlockSpec((B * d, 2 * n_out), lambda i: (0, 0)),
    )

    out = pl.pallas_call(
        kernel,
        out_shape=jax.ShapeDtypeStruct((B * d, 2 * n_out), jnp.float32),
        grid_spec=grid_spec,
        compiler_params=pltpu.CompilerParams(
            dimension_semantics=("arbitrary",)),
    )(x2d, W1T, b1_2d, W2T, b2_2d, adj_Aforz, c)

    x = out[:, :n_out].reshape(B, d, n_out)
    logits = out[:, n_out:].reshape(B, d, n_out)
    return x, logits


# ---------------------------------------------------------------------------
# Module-level forward (glue in plain JAX, hot path in Pallas)
# ---------------------------------------------------------------------------
def preprocess_adj_new(adj):
    I = jnp.eye(adj.shape[0], dtype=adj.dtype)
    return I - adj.T


@jax.jit
def mlp_encoder_forward(params, inputs):
    adj_A = params["adj_A"]
    Wa = params["Wa"]
    W1, b1 = params["fc1_w"], params["fc1_b"]
    W2, b2 = params["fc2_w"], params["fc2_b"]

    # TODO(synk): torch prints 'nan error' when adj_A has NaNs; no print in jit.
    adj_A1 = jnp.sinh(3.0 * adj_A)
    adj_Aforz = preprocess_adj_new(adj_A1)
    adj_A_eye = jnp.eye(adj_A1.shape[0], dtype=adj_A1.dtype)

    x, logits = mlp_encoder_pallas(inputs, adj_Aforz, W1, b1, W2, b2, Wa)

    # Same broadcasting semantics as the PyTorch line
    # torch.sum(|adj_A| + |Wa| + |fc1.weight| + |fc2.weight|)
    l1_loss = jnp.sum(jnp.abs(adj_A) + jnp.abs(Wa) + jnp.abs(W1) + jnp.abs(W2))

    return (l1_loss, x, logits, adj_A1, adj_A_eye,
            params["z"], params["z_positive"], adj_A, Wa)


# ---------------------------------------------------------------------------
# Deterministic parameter construction (mirrors MLPEncoder.__init__)
# ---------------------------------------------------------------------------
def init_params(key, d, n_xdims, n_hid, n_out, tol=0.1):
    k_adj, k_w1, k_b1, k_w2, k_b2 = jax.random.split(key, 5)

    adj_A = 0.01 * jax.random.normal(k_adj, (d, d), dtype=jnp.float32)

    # xavier_normal_ for Linear weights
    std1 = (2.0 / (n_xdims + n_hid)) ** 0.5
    std2 = (2.0 / (n_hid + n_out)) ** 0.5
    W1 = std1 * jax.random.normal(k_w1, (n_hid, n_xdims), dtype=jnp.float32)
    W2 = std2 * jax.random.normal(k_w2, (n_out, n_hid), dtype=jnp.float32)

    # nn.Linear default bias init: U(-1/sqrt(fan_in), 1/sqrt(fan_in))
    bnd1 = 1.0 / (n_xdims ** 0.5)
    bnd2 = 1.0 / (n_hid ** 0.5)
    b1 = jax.random.uniform(k_b1, (n_hid,), minval=-bnd1, maxval=bnd1,
                            dtype=jnp.float32)
    b2 = jax.random.uniform(k_b2, (n_out,), minval=-bnd2, maxval=bnd2,
                            dtype=jnp.float32)

    return {
        "adj_A": adj_A,
        "Wa": jnp.zeros((n_out,), dtype=jnp.float32),
        "fc1_w": W1, "fc1_b": b1,
        "fc2_w": W2, "fc2_b": b2,
        "z": jnp.asarray(tol, dtype=jnp.float32),
        "z_positive": jnp.ones((d, d), dtype=jnp.float32),
    }


if __name__ == "__main__":
    # Shapes chosen so the PyTorch l1_loss broadcasting
    # (|adj_A|[d,d] + |Wa|[n_out] + |W1|[n_hid,n_xdims] + |W2|[n_out,n_hid])
    # is valid: d == n_hid == n_out == n_xdims.
    B, d, n_xdims, n_hid, n_out = 2, 16, 16, 16, 16

    key = jax.random.PRNGKey(0)
    k_params, k_in = jax.random.split(key)
    params = init_params(k_params, d, n_xdims, n_hid, n_out)
    inputs = jax.random.normal(k_in, (B, d, n_xdims), dtype=jnp.float32)

    outs = mlp_encoder_forward(params, inputs)
    outs = jax.block_until_ready(outs)
    (l1_loss, x, logits, adj_A1, adj_A_eye, z, z_pos, adj_A, Wa) = outs

    # Pure-JAX reference (HIGHEST precision so it tracks the f32 MXU result,
    # including the un-hoisted adj @ (x + Wa) - Wa formulation).
    hp = jax.lax.Precision.HIGHEST
    adj_A1_ref = jnp.sinh(3.0 * params["adj_A"])
    adj_Aforz_ref = jnp.eye(d, dtype=jnp.float32) - adj_A1_ref.T
    H1_ref = jnp.maximum(
        jnp.einsum("bdx,hx->bdh", inputs, params["fc1_w"], precision=hp)
        + params["fc1_b"], 0.0)
    x_ref = (jnp.einsum("bdh,oh->bdo", H1_ref, params["fc2_w"], precision=hp)
             + params["fc2_b"])
    logits_ref = (jnp.einsum("uv,bvo->buo", adj_Aforz_ref,
                             x_ref + params["Wa"], precision=hp)
                  - params["Wa"])

    assert x.shape == (B, d, n_out)
    assert logits.shape == (B, d, n_out)
    assert adj_A1.shape == (d, d)
    assert jnp.isfinite(l1_loss)
    assert jnp.allclose(x, x_ref, atol=1e-4, rtol=1e-4)
    assert jnp.allclose(logits, logits_ref, atol=1e-4, rtol=1e-4)
    print("KERNEL_OK")
</pallas_src>

<mosaic_0001>
module attributes {stable_mosaic.version = 11 : i64} {
  func.func @_mlp_encoder_kernel(%arg0: i32, %arg1: memref<32x16xf32, #tpu.memory_space<vmem>>, %arg2: memref<16x16xf32, #tpu.memory_space<vmem>>, %arg3: memref<1x16xf32, #tpu.memory_space<vmem>>, %arg4: memref<16x16xf32, #tpu.memory_space<vmem>>, %arg5: memref<1x16xf32, #tpu.memory_space<vmem>>, %arg6: memref<16x16xf32, #tpu.memory_space<vmem>>, %arg7: memref<16x16xf32, #tpu.memory_space<vmem>>, %arg8: memref<32x32xf32, #tpu.memory_space<vmem>>) attributes {dimension_semantics = [#tpu.dimension_semantics<arbitrary>], iteration_bounds = array<i64: 1>, scalar_prefetch = 0 : i64, scratch_operands = 0 : i64, tpu.core_type = #tpu.core_type<tc>, window_params = [{pipeline_mode = #tpu.pipeline_mode<synchronous>, transform_indices = @transform_0, window_bounds = array<i64: 32, 16>}, {pipeline_mode = #tpu.pipeline_mode<synchronous>, transform_indices = @transform_1, window_bounds = array<i64: 16, 16>}, {pipeline_mode = #tpu.pipeline_mode<synchronous>, transform_indices = @transform_2, window_bounds = array<i64: 1, 16>}, {pipeline_mode = #tpu.pipeline_mode<synchronous>, transform_indices = @transform_3, window_bounds = array<i64: 16, 16>}, {pipeline_mode = #tpu.pipeline_mode<synchronous>, transform_indices = @transform_4, window_bounds = array<i64: 1, 16>}, {pipeline_mode = #tpu.pipeline_mode<synchronous>, transform_indices = @transform_5, window_bounds = array<i64: 16, 16>}, {pipeline_mode = #tpu.pipeline_mode<synchronous>, transform_indices = @transform_6, window_bounds = array<i64: 16, 16>}, {pipeline_mode = #tpu.pipeline_mode<synchronous>, transform_indices = @transform_7, window_bounds = array<i64: 32, 32>}]} {
    %c0 = arith.constant 0 : index
    %c0_0 = arith.constant 0 : index
    %0 = vector.load %arg1[%c0, %c0_0] : memref<32x16xf32, #tpu.memory_space<vmem>>, vector<32x16xf32>
    %c0_1 = arith.constant 0 : index
    %c0_2 = arith.constant 0 : index
    %1 = vector.load %arg2[%c0_1, %c0_2] : memref<16x16xf32, #tpu.memory_space<vmem>>, vector<16x16xf32>
    %cst = arith.constant dense<0.000000e+00> : vector<32x16xf32>
    %2 = tpu.matmul %0, %1, %cst {dimension_numbers = #tpu.dot_dimension_numbers<[1], [0], [0], [1], [0, 0, 1, 1], [], []>} : vector<32x16xf32>, vector<16x16xf32>, vector<32x16xf32> -> vector<32x16xf32>
    %c0_3 = arith.constant 0 : index
    %c0_4 = arith.constant 0 : index
    %3 = vector.load %arg3[%c0_3, %c0_4] : memref<1x16xf32, #tpu.memory_space<vmem>>, vector<1x16xf32>
    %4 = vector.broadcast %3 : vector<1x16xf32> to vector<32x16xf32>
    %5 = arith.addf %2, %4 : vector<32x16xf32>
    %cst_5 = arith.constant 0.000000e+00 : f32
    %6 = vector.broadcast %cst_5 : f32 to vector<32x16xf32>
    %7 = arith.maximumf %5, %6 : vector<32x16xf32>
    %c0_6 = arith.constant 0 : index
    %c0_7 = arith.constant 0 : index
    %8 = vector.load %arg4[%c0_6, %c0_7] : memref<16x16xf32, #tpu.memory_space<vmem>>, vector<16x16xf32>
    %cst_8 = arith.constant dense<0.000000e+00> : vector<32x16xf32>
    %9 = tpu.matmul %7, %8, %cst_8 {dimension_numbers = #tpu.dot_dimension_numbers<[1], [0], [0], [1], [0, 0, 1, 1], [], []>} : vector<32x16xf32>, vector<16x16xf32>, vector<32x16xf32> -> vector<32x16xf32>
    %c0_9 = arith.constant 0 : index
    %c0_10 = arith.constant 0 : index
    %10 = vector.load %arg5[%c0_9, %c0_10] : memref<1x16xf32, #tpu.memory_space<vmem>>, vector<1x16xf32>
    %11 = vector.broadcast %10 : vector<1x16xf32> to vector<32x16xf32>
    %12 = arith.addf %9, %11 : vector<32x16xf32>
    %c0_11 = arith.constant 0 : index
    %c0_12 = arith.constant 0 : index
    %13 = vector.load %arg6[%c0_11, %c0_12] : memref<16x16xf32, #tpu.memory_space<vmem>>, vector<16x16xf32>
    %c0_13 = arith.constant 0 : index
    %c0_14 = arith.constant 0 : index
    %14 = vector.load %arg7[%c0_13, %c0_14] : memref<16x16xf32, #tpu.memory_space<vmem>>, vector<16x16xf32>
    %15 = vector.extract_strided_slice %12 {offsets = [0, 0], sizes = [16, 16], strides = [1, 1]} : vector<32x16xf32> to vector<16x16xf32>
    %cst_15 = arith.constant dense<0.000000e+00> : vector<16x16xf32>
    %16 = tpu.matmul %13, %15, %cst_15 {dimension_numbers = #tpu.dot_dimension_numbers<[1], [0], [0], [1], [0, 0, 1, 1], [], []>} : vector<16x16xf32>, vector<16x16xf32>, vector<16x16xf32> -> vector<16x16xf32>
    %17 = arith.addf %16, %14 : vector<16x16xf32>
    %18 = vector.extract_strided_slice %12 {offsets = [16, 0], sizes = [16, 16], strides = [1, 1]} : vector<32x16xf32> to vector<16x16xf32>
    %cst_16 = arith.constant dense<0.000000e+00> : vector<16x16xf32>
    %19 = tpu.matmul %13, %18, %cst_16 {dimension_numbers = #tpu.dot_dimension_numbers<[1], [0], [0], [1], [0, 0, 1, 1], [], []>} : vector<16x16xf32>, vector<16x16xf32>, vector<16x16xf32> -> vector<16x16xf32>
    %20 = arith.addf %19, %14 : vector<16x16xf32>
    %21 = tpu.concatenate %17, %20 in 0 : vector<16x16xf32>, vector<16x16xf32> -> vector<32x16xf32>
    %22 = tpu.concatenate %12, %21 in 1 : vector<32x16xf32>, vector<32x16xf32> -> vector<32x32xf32>
    %c0_17 = arith.constant 0 : index
    %c0_18 = arith.constant 0 : index
    %23 = vector.load %arg8[%c0_17, %c0_18] : memref<32x32xf32, #tpu.memory_space<vmem>>, vector<32x32xf32>
    tpu.vector_store %arg8[%c0_17, %c0_18], %22 {strides = array<i32>} : memref<32x32xf32, #tpu.memory_space<vmem>>, vector<32x32xf32>,
    return
  }
  func.func @transform_0(%arg0: i32) -> (i32, i32) {
    %c0_i32 = arith.constant 0 : i32
    %c0_i32_0 = arith.constant 0 : i32
    %c0_i32_1 = arith.constant 0 : i32
    return %c0_i32, %c0_i32_0 : i32, i32
  }
  func.func @transform_1(%arg0: i32) -> (i32, i32) {
    %c0_i32 = arith.constant 0 : i32
    %c0_i32_0 = arith.constant 0 : i32
    %c0_i32_1 = arith.constant 0 : i32
    return %c0_i32, %c0_i32_0 : i32, i32
  }
  func.func @transform_2(%arg0: i32) -> (i32, i32) {
    %c0_i32 = arith.constant 0 : i32
    %c0_i32_0 = arith.constant 0 : i32
    %c0_i32_1 = arith.constant 0 : i32
    return %c0_i32, %c0_i32_0 : i32, i32
  }
  func.func @transform_3(%arg0: i32) -> (i32, i32) {
    %c0_i32 = arith.constant 0 : i32
    %c0_i32_0 = arith.constant 0 : i32
    %c0_i32_1 = arith.constant 0 : i32
    return %c0_i32, %c0_i32_0 : i32, i32
  }
  func.func @transform_4(%arg0: i32) -> (i32, i32) {
    %c0_i32 = arith.constant 0 : i32
    %c0_i32_0 = arith.constant 0 : i32
    %c0_i32_1 = arith.constant 0 : i32
    return %c0_i32, %c0_i32_0 : i32, i32
  }
  func.func @transform_5(%arg0: i32) -> (i32, i32) {
    %c0_i32 = arith.constant 0 : i32
    %c0_i32_0 = arith.constant 0 : i32
    %c0_i32_1 = arith.constant 0 : i32
    return %c0_i32, %c0_i32_0 : i32, i32
  }
  func.func @transform_6(%arg0: i32) -> (i32, i32) {
    %c0_i32 = arith.constant 0 : i32
    %c0_i32_0 = arith.constant 0 : i32
    %c0_i32_1 = arith.constant 0 : i32
    return %c0_i32, %c0_i32_0 : i32, i32
  }
  func.func @transform_7(%arg0: i32) -> (i32, i32) {
    %c0_i32 = arith.constant 0 : i32
    %c0_i32_0 = arith.constant 0 : i32
    %c0_i32_1 = arith.constant 0 : i32
    return %c0_i32, %c0_i32_0 : i32, i32
  }
}

</mosaic_0001>

<bundles_post_ra>
// kernel: mlp_encoder_forward.1
= control target key start
LH: loop header
LB: loop body
LE: loop exit
PB: predicated region body
PF: predicated region fallthrough
CT: control target
= control target key end

     0   :  { %vm36_vm0 = vcmask 130048   ;;  %s233_s22 = smov 16   ;;  %vm205_vm1 = vcmask 261120   ;;  %s344_s1 = inlined_call_operand.vmem [shape: f32[16,16], index: 1, kind: input, shape index: {}]   ;;  %s345_s0 = inlined_call_operand.vmem [shape: f32[32,16], index: 0, kind: input, shape index: {}]   ;;  %s346_s2 = inlined_call_operand.vmem [shape: f32[1,16], index: 2, kind: input, shape index: {}]   ;;  %s347_s4 = inlined_call_operand.vmem [shape: f32[1,16], index: 4, kind: input, shape index: {}]   ;;  %s348_s3 = inlined_call_operand.vmem [shape: f32[16,16], index: 3, kind: input, shape index: {}]   ;;  %s349_s5 = inlined_call_operand.vmem [shape: f32[16,16], index: 5, kind: input, shape index: {}]   ;;  %s350_s6 = inlined_call_operand.vmem [shape: f32[16,16], index: 6, kind: input, shape index: {}]   ;;  %s351_s7 = inlined_call_operand.vmem [shape: f32[32,32], index: 7, kind: output, shape index: {}]  }
   0x1   :  { %v31_v0 = vld [vmem:[%s344_s1 + $0x8] sm:$0xff]  ;;  %v30_v1 = vld [vmem:[%s344_s1] sm:$0xff]  ;;  %v29_v3 = vld [vmem:[%s345_s0 + $0x18] sm:$0xff] }
   0x2   :  { %63 = vmatpush.msra.mxu0 %v31_v0  ;;  %226 = vmatpush.msra.mxu2 %v31_v0  ;;  %v26_v2 = vld [vmem:[%s345_s0] sm:$0xff]  ;;  %v27_v4 = vld [vmem:[%s345_s0 + $0x8] sm:$0xff]  ;;  %v28_v5 = vld [vmem:[%s345_s0 + $0x10] sm:$0xff] }
   0x3   :  { %v83_v6 = vld [vmem:[%s348_s3 + $0x8] sm:$0xff]  ;;  %v82_v7 = vld [vmem:[%s348_s3] sm:$0xff] }
   0x4   :  { %64 = vmatpush.msra.mxu0 %v30_v1  ;;  %227 = vmatpush.msra.mxu2 %v30_v1  ;;  %v231_v8 = vld [vmem:[%s346_s2] ss:$0 sm:$0xff]  ;;  %v130_v31 = vld [vmem:[%s349_s5 + $0x8] sm:$0xff] }
   0x5   :  { %214 = vmatmul.msk.f32.vlgmr.msra.gmra.mxu0 %vm36_vm0, %v26_v2  ;;  %217 = vmatmul.msk.f32.vlgmr.msra.gmra.mxu2 %vm36_vm0, %v29_v3  ;;  %v232_v22 = vld [vmem:[%s347_s4] ss:$0 sm:$0xff]  ;;  %v132_v36 = vld [vmem:[%s350_s6 + $0x8] sm:$0xff] }
   0x6   :  { %114 = vmatpush.msra.mxu1 %v83_v6  ;;  %228 = vmatpush.msra.mxu3 %v83_v6  ;;  %v129_v26 = vld [vmem:[%s349_s5] sm:$0xff] }
   0x7   :  { %v131_v32 = vld [vmem:[%s350_s6] sm:$0xff] }
   0x8   :  { %115 = vmatpush.msra.mxu1 %v82_v7  ;;  %229 = vmatpush.msra.mxu3 %v82_v7 }
   0xd   :  { %215 = vmatmul.msk.f32.gmra.mxu0 %vm36_vm0, %v27_v4 }
  0x15   :  { %216 = vmatmul.msk.f32.gmra.mxu0 %vm36_vm0, %v28_v5 }
  0x82   :  { %v66_v9 = vpop.f32.mrf.mxu0 }
  0x83   :  { %v67_v10 = vadd.f32 %v231_v8, %v66_v9 }
  0x85   :  { %v78_v11 = vmax.f32 %v67_v10, 0.0 }
  0x87   :  { %218 = vmatmul.msk.f32.vlgmr.msra.gmra.mxu1 %vm36_vm0, %v78_v11 }
  0x88   :  { %v75_v12 = vpop.f32.mrf.mxu2 }
  0x89   :  { %v76_v13 = vadd.f32 %v231_v8, %v75_v12 }
  0x8a   :  { %v69_v14 = vpop.f32.mrf.mxu0 }
  0x8b   :  { %v81_v15 = vmax.f32 %v76_v13, 0.0  ;;  %v70_v16 = vadd.f32 %v231_v8, %v69_v14 }
  0x8d   :  { %v79_v17 = vmax.f32 %v70_v16, 0.0  ;;  %221 = vmatmul.msk.f32.vlgmr.msra.gmra.mxu3 %vm36_vm0, %v81_v15 }
  0x8f   :  { %219 = vmatmul.msk.f32.gmra.mxu1 %vm36_vm0, %v79_v17 }
  0x92   :  { %v72_v18 = vpop.f32.mrf.mxu0 }
  0x93   :  { %v73_v19 = vadd.f32 %v231_v8, %v72_v18 }
  0x95   :  { %v80_v20 = vmax.f32 %v73_v19, 0.0 }
  0x97   :  { %220 = vmatmul.msk.f32.gmra.mxu1 %vm36_vm0, %v80_v20 }
 0x104   :  { %v117_v21 = vpop.f32.mrf.mxu1 }
 0x105   :  { %v118_v25 = vadd.f32 %v232_v22, %v117_v21 }
 0x10c   :  { %v120_v23 = vpop.f32.mrf.mxu1 }
 0x10d   :  { %v121_v24 = vadd.f32 %v232_v22, %v120_v23 }
 0x10f   :  { %153 = vmatpush.msrb.mxu2 %v121_v24 }
 0x110   :  { %v126_v27 = vpop.f32.mrf.mxu3 }
 0x111   :  { %v127_v28 = vadd.f32 %v232_v22, %v126_v27  ;;  %154 = vmatpush.msrb.mxu2 %v118_v25 }
 0x112   :  { %222 = vmatmul.msk.f32.vlgmr.msrb.gmra.mxu2 %vm36_vm0, %v129_v26 }
 0x113   :  { %176 = vmatpush.msrb.mxu3 %v127_v28 }
 0x114   :  { %v123_v29 = vpop.f32.mrf.mxu1 }
 0x115   :  { %v124_v30 = vadd.f32 %v232_v22, %v123_v29 }
 0x117   :  { %177 = vmatpush.msrb.mxu3 %v124_v30 }
 0x118   :  { %224 = vmatmul.msk.f32.vlgmr.msrb.gmra.mxu3 %vm36_vm0, %v129_v26 }
 0x11a   :  { %223 = vmatmul.msk.f32.gmra.mxu2 %vm36_vm0, %v130_v31 }
 0x120   :  { %225 = vmatmul.msk.f32.gmra.mxu3 %vm36_vm0, %v130_v31 }
 0x195   :  { %v156_v33 = vpop.f32.mrf.mxu2 }
 0x196   :  { %v157_v34 = vadd.f32 %v156_v33, %v131_v32 }
 0x198   :  { %189 = vrot.lane.b32.xlu0 %v157_v34, %s233_s22 }
 0x19b   :  { %v179_v35 = vpop.f32.mrf.mxu3 }
 0x19c   :  { %v180_v37 = vadd.f32 %v179_v35, %v131_v32 }
 0x19d   :  { %v159_v38 = vpop.f32.mrf.mxu2 }
 0x19e   :  { %v160_v39 = vadd.f32 %v159_v38, %v132_v36  ;;  %193 = vrot.lane.b32.xlu1 %v180_v37, %s233_s22 }
 0x1a0   :  { %191 = vrot.lane.b32.xlu0 %v160_v39, %s233_s22 }
 0x1a3   :  { %v182_v40 = vpop.f32.mrf.mxu3 }
 0x1a4   :  { %v183_v41 = vadd.f32 %v182_v40, %v132_v36 }
 0x1a6   :  { %195 = vrot.lane.b32.xlu1 %v183_v41, %s233_s22 }
 0x20a   :  { %v190_v42 = vpop.permute.xlu0 %189 }
 0x20b   :  { %v201_v43 = vsel %vm36_vm0, %v118_v25, %v190_v42 }
 0x20c   :  { %206 = vst.msk [vmem:[%s351_s7] sm:$0xff] %vm205_vm1, %v201_v43 }
 0x210   :  { %v194_v44 = vpop.permute.xlu1 %193 }
 0x211   :  { %v203_v45 = vsel %vm36_vm0, %v124_v30, %v194_v44 }
 0x212   :  { %208 = vst.msk [vmem:[%s351_s7 + $0x10] sm:$0xff] %vm205_vm1, %v203_v45  ;;  %v192_v46 = vpop.permute.xlu0 %191 }
 0x213   :  { %v202_v47 = vsel %vm36_vm0, %v121_v24, %v192_v46 }
 0x214   :  { %207 = vst.msk [vmem:[%s351_s7 + $0x8] sm:$0xff] %vm205_vm1, %v202_v47 }
 0x218   :  { %v196_v48 = vpop.permute.xlu1 %195 }
 0x219   :  { %v204_v49 = vsel %vm36_vm0, %v127_v28, %v196_v48 }
 0x21a   :  { %209 = vst.msk [vmem:[%s351_s7 + $0x18] sm:$0xff] %vm205_vm1, %v204_v49 }

</bundles_post_ra>
